<compile_context>
chip_gen: v7x
topology: tpu7x:2x2x1
jax: 0.10.0
libtpu: 0.0.40
codegen_flags: <defaults>
</compile_context>

<pallas_src>
import jax
import jax.numpy as jnp
from jax.experimental import pallas as pl
from jax.experimental.pallas import tpu as pltpu


def mlp_kernel(x_ref, w1t_ref, b1_ref, w2t_ref, b2_ref, w3t_ref, b3_ref, out_ref):
    """One batch tile.  Feature-major: activations are (features, batch)."""
    dot_dt = w1t_ref.dtype

    # x tile arrives batch-major (BM, d_in); transposing it puts the batch on
    # the lane axis so every subsequent vreg is lane-dense.  The transpose is
    # consumed directly by the dot (transposed-RHS matmul).
    xt = x_ref[...].astype(dot_dt).T                                  # (d_in, BM)

    # fc1 + relu:   (d_h, d_in) @ (d_in, BM) -> (d_h, BM)
    h1 = jnp.dot(w1t_ref[...], xt, preferred_element_type=jnp.float32) + b1_ref[...]
    h1 = jnp.maximum(h1, 0.0)

    # fc2 + relu:   (d_out, d_h) @ (d_h, BM) -> (d_out, BM)
    h2 = jnp.dot(w2t_ref[...], h1.astype(dot_dt),
                 preferred_element_type=jnp.float32) + b2_ref[...]
    h2 = jnp.maximum(h2, 0.0)

    # fc3 + sigmoid: (1, d_out) @ (d_out, BM) -> (1, BM)  — lane-dense row.
    z = jnp.dot(w3t_ref[...], h2.astype(dot_dt),
                preferred_element_type=jnp.float32) + b3_ref[...]
    out_ref[...] = jax.nn.sigmoid(z)[None].astype(out_ref.dtype)      # (1, 1, BM)


def prepare_mlp_params(w1, b1, w2, b2, w3, b3, *, dot_dtype=jnp.float32):
    """One-time parameter preparation (hoisted out of the per-forward path)."""
    return dict(
        w1t=jnp.asarray(w1, dot_dtype).T,                  # (d_h, d_in)
        b1c=jnp.asarray(b1, jnp.float32).reshape(-1, 1),   # (d_h, 1)
        w2t=jnp.asarray(w2, dot_dtype).T,                  # (d_out, d_h)
        b2c=jnp.asarray(b2, jnp.float32).reshape(-1, 1),   # (d_out, 1)
        w3t=jnp.asarray(w3, dot_dtype).T,                  # (1, d_out)
        b3c=jnp.asarray(b3, jnp.float32).reshape(1, 1),    # (1, 1)
        dot_dtype=dot_dtype,
    )


def _pick_block_m(b):
    if b <= 512:
        return b                      # single grid step: no pipeline overhead
    bm = 512
    # For large batches keep >= 4 grid steps so each of v7x's 2 TCs still has
    # at least 2 pipelined iterations (v5e/v6e: 1 TC, biggest tile wins).
    while bm > 128 and (b % bm != 0 or b // bm < 4):
        bm //= 2
    return bm if b % bm == 0 else b


def mlp_forward(x, params, *, block_m=None):
    b, d_in = x.shape
    w1t, b1c = params["w1t"], params["b1c"]
    w2t, b2c = params["w2t"], params["b2c"]
    w3t, b3c = params["w3t"], params["b3c"]
    dot_dtype = params["dot_dtype"]
    d_h, d_out = w1t.shape[0], w2t.shape[0]

    if block_m is None:
        block_m = _pick_block_m(b)
    assert b % block_m == 0, "batch must be a multiple of block_m"
    num_blocks = b // block_m

    if x.dtype != dot_dtype:
        x = x.astype(dot_dtype)
    isz = jnp.dtype(dot_dtype).itemsize

    cost = pl.CostEstimate(
        flops=2 * b * (d_in * d_h + d_h * d_out + d_out * 1),
        transcendentals=b,                                  # one sigmoid / row
        bytes_accessed=(isz * (b * d_in + d_in * d_h + d_h * d_out + d_out)
                        + 4 * (d_h + d_out + 1)             # f32 biases
                        + 4 * b),                           # lane-dense f32 out
    )

    vmem = pltpu.MemorySpace.VMEM
    out3 = pl.pallas_call(
        mlp_kernel,
        out_shape=jax.ShapeDtypeStruct((num_blocks, 1, block_m), jnp.float32),
        grid=(num_blocks,),
        in_specs=[
            pl.BlockSpec((block_m, d_in), lambda i: (i, 0), memory_space=vmem),
            pl.BlockSpec((d_h, d_in),     lambda i: (0, 0), memory_space=vmem),
            pl.BlockSpec((d_h, 1),        lambda i: (0, 0), memory_space=vmem),
            pl.BlockSpec((d_out, d_h),    lambda i: (0, 0), memory_space=vmem),
            pl.BlockSpec((d_out, 1),      lambda i: (0, 0), memory_space=vmem),
            pl.BlockSpec((1, d_out),      lambda i: (0, 0), memory_space=vmem),
            pl.BlockSpec((1, 1),          lambda i: (0, 0), memory_space=vmem),
        ],
        out_specs=pl.BlockSpec((1, 1, block_m), lambda i: (i, 0, 0),
                               memory_space=vmem),
        compiler_params=pltpu.CompilerParams(dimension_semantics=("parallel",)),
        cost_estimate=cost,
    )(x, w1t, b1c, w2t, b2c, w3t, b3c)

    # (num_blocks, 1, block_m) flattens in exact batch order.
    return out3.reshape(b, 1)


if __name__ == "__main__":
    # Small shapes consistent with MLP(input_dim, hidden_dim, output_dim).
    batch, input_dim, hidden_dim, output_dim = 256, 64, 128, 32

    key = jax.random.PRNGKey(0)
    k = jax.random.split(key, 7)

    def linear_init(kw, kb, fan_in, fan_out):
        # torch.nn.Linear default: U(-1/sqrt(fan_in), 1/sqrt(fan_in)).
        bound = float(fan_in) ** -0.5
        w = jax.random.uniform(kw, (fan_in, fan_out), jnp.float32, -bound, bound)
        bias = jax.random.uniform(kb, (fan_out,), jnp.float32, -bound, bound)
        return w, bias

    x = jax.random.normal(k[0], (batch, input_dim), dtype=jnp.float32)
    w1, b1 = linear_init(k[1], k[2], input_dim, hidden_dim)
    w2, b2 = linear_init(k[3], k[4], hidden_dim, output_dim)
    w3, b3 = linear_init(k[5], k[6], output_dim, 1)

    # One-time parameter prep.  For v6e/v7x throughput (at the cost of exact
    # f32 parity) pass dot_dtype=jnp.bfloat16 and loosen the tolerance below.
    params = prepare_mlp_params(w1, b1, w2, b2, w3, b3, dot_dtype=jnp.float32)

    out = mlp_forward(x, params)
    jax.block_until_ready(out)

    # Pure-JAX reference of the exact torch forward semantics.
    h = jnp.maximum(x @ w1 + b1, 0.0)
    h = jnp.maximum(h @ w2 + b2, 0.0)
    ref = jax.nn.sigmoid(h @ w3 + b3)

    assert out.shape == (batch, 1)
    assert jnp.allclose(out, ref, atol=1e-4, rtol=1e-4), float(
        jnp.max(jnp.abs(out - ref)))

    print("KERNEL_OK")
</pallas_src>

<mosaic_0001>
module attributes {stable_mosaic.version = 11 : i64} {
  func.func @mlp_kernel(%arg0: i32, %arg1: memref<256x64xf32, #tpu.memory_space<vmem>>, %arg2: memref<128x64xf32, #tpu.memory_space<vmem>>, %arg3: memref<128x1xf32, #tpu.memory_space<vmem>>, %arg4: memref<32x128xf32, #tpu.memory_space<vmem>>, %arg5: memref<32x1xf32, #tpu.memory_space<vmem>>, %arg6: memref<1x32xf32, #tpu.memory_space<vmem>>, %arg7: memref<1x1xf32, #tpu.memory_space<vmem>>, %arg8: memref<1x1x256xf32, #tpu.memory_space<vmem>>) attributes {dimension_semantics = [#tpu.dimension_semantics<parallel>], iteration_bounds = array<i64: 1>, scalar_prefetch = 0 : i64, scratch_operands = 0 : i64, tpu.core_type = #tpu.core_type<tc>, window_params = [{transform_indices = @transform_0, window_bounds = array<i64: 256, 64>}, {pipeline_mode = #tpu.pipeline_mode<synchronous>, transform_indices = @transform_1, window_bounds = array<i64: 128, 64>}, {pipeline_mode = #tpu.pipeline_mode<synchronous>, transform_indices = @transform_2, window_bounds = array<i64: 128, 1>}, {pipeline_mode = #tpu.pipeline_mode<synchronous>, transform_indices = @transform_3, window_bounds = array<i64: 32, 128>}, {pipeline_mode = #tpu.pipeline_mode<synchronous>, transform_indices = @transform_4, window_bounds = array<i64: 32, 1>}, {pipeline_mode = #tpu.pipeline_mode<synchronous>, transform_indices = @transform_5, window_bounds = array<i64: 1, 32>}, {pipeline_mode = #tpu.pipeline_mode<synchronous>, transform_indices = @transform_6, window_bounds = array<i64: 1, 1>}, {transform_indices = @transform_7, window_bounds = array<i64: 1, 1, 256>}]} {
    %c0 = arith.constant 0 : index
    %c0_0 = arith.constant 0 : index
    %0 = vector.load %arg1[%c0, %c0_0] : memref<256x64xf32, #tpu.memory_space<vmem>>, vector<256x64xf32>
    %1 = tpu.transpose %0, [1, 0] : vector<256x64xf32> -> vector<64x256xf32>
    %c0_1 = arith.constant 0 : index
    %c0_2 = arith.constant 0 : index
    %2 = vector.load %arg2[%c0_1, %c0_2] : memref<128x64xf32, #tpu.memory_space<vmem>>, vector<128x64xf32>
    %cst = arith.constant dense<0.000000e+00> : vector<128x256xf32>
    %3 = tpu.matmul %2, %1, %cst {dimension_numbers = #tpu.dot_dimension_numbers<[1], [0], [0], [1], [0, 0, 1, 1], [], []>} : vector<128x64xf32>, vector<64x256xf32>, vector<128x256xf32> -> vector<128x256xf32>
    %c0_3 = arith.constant 0 : index
    %c0_4 = arith.constant 0 : index
    %4 = vector.load %arg3[%c0_3, %c0_4] : memref<128x1xf32, #tpu.memory_space<vmem>>, vector<128x1xf32>
    %5 = vector.broadcast %4 : vector<128x1xf32> to vector<128x256xf32>
    %6 = arith.addf %3, %5 : vector<128x256xf32>
    %cst_5 = arith.constant 0.000000e+00 : f32
    %7 = vector.broadcast %cst_5 : f32 to vector<128x256xf32>
    %8 = arith.maximumf %6, %7 : vector<128x256xf32>
    %c0_6 = arith.constant 0 : index
    %c0_7 = arith.constant 0 : index
    %9 = vector.load %arg4[%c0_6, %c0_7] : memref<32x128xf32, #tpu.memory_space<vmem>>, vector<32x128xf32>
    %cst_8 = arith.constant dense<0.000000e+00> : vector<32x256xf32>
    %10 = tpu.matmul %9, %8, %cst_8 {dimension_numbers = #tpu.dot_dimension_numbers<[1], [0], [0], [1], [0, 0, 1, 1], [], []>} : vector<32x128xf32>, vector<128x256xf32>, vector<32x256xf32> -> vector<32x256xf32>
    %c0_9 = arith.constant 0 : index
    %c0_10 = arith.constant 0 : index
    %11 = vector.load %arg5[%c0_9, %c0_10] : memref<32x1xf32, #tpu.memory_space<vmem>>, vector<32x1xf32>
    %12 = vector.broadcast %11 : vector<32x1xf32> to vector<32x256xf32>
    %13 = arith.addf %10, %12 : vector<32x256xf32>
    %cst_11 = arith.constant 0.000000e+00 : f32
    %14 = vector.broadcast %cst_11 : f32 to vector<32x256xf32>
    %15 = arith.maximumf %13, %14 : vector<32x256xf32>
    %c0_12 = arith.constant 0 : index
    %c0_13 = arith.constant 0 : index
    %16 = vector.load %arg6[%c0_12, %c0_13] : memref<1x32xf32, #tpu.memory_space<vmem>>, vector<1x32xf32>
    %cst_14 = arith.constant dense<0.000000e+00> : vector<1x256xf32>
    %17 = tpu.matmul %16, %15, %cst_14 {dimension_numbers = #tpu.dot_dimension_numbers<[1], [0], [0], [1], [0, 0, 1, 1], [], []>} : vector<1x32xf32>, vector<32x256xf32>, vector<1x256xf32> -> vector<1x256xf32>
    %c0_15 = arith.constant 0 : index
    %c0_16 = arith.constant 0 : index
    %18 = vector.load %arg7[%c0_15, %c0_16] : memref<1x1xf32, #tpu.memory_space<vmem>>, vector<1x1xf32>
    %19 = vector.broadcast %18 : vector<1x1xf32> to vector<1x256xf32>
    %20 = arith.addf %17, %19 : vector<1x256xf32>
    %21 = arith.negf %20 : vector<1x256xf32>
    %22 = math.exp %21 : vector<1x256xf32>
    %cst_17 = arith.constant 1.000000e+00 : f32
    %23 = vector.broadcast %cst_17 : f32 to vector<1x256xf32>
    %24 = arith.addf %23, %22 : vector<1x256xf32>
    %25 = arith.divf %23, %24 : vector<1x256xf32>
    %26 = vector.shape_cast %25 : vector<1x256xf32> to vector<1x1x256xf32>
    %c0_18 = arith.constant 0 : index
    %c0_19 = arith.constant 0 : index
    %c0_20 = arith.constant 0 : index
    %27 = vector.load %arg8[%c0_18, %c0_19, %c0_20] : memref<1x1x256xf32, #tpu.memory_space<vmem>>, vector<1x1x256xf32>
    tpu.vector_store %arg8[%c0_18, %c0_19, %c0_20], %26 {strides = array<i32>} : memref<1x1x256xf32, #tpu.memory_space<vmem>>, vector<1x1x256xf32>,
    return
  }
  func.func @transform_0(%arg0: i32) -> (i32, i32) {
    %c0_i32 = arith.constant 0 : i32
    %c0_i32_0 = arith.constant 0 : i32
    return %arg0, %c0_i32 : i32, i32
  }
  func.func @transform_1(%arg0: i32) -> (i32, i32) {
    %c0_i32 = arith.constant 0 : i32
    %c0_i32_0 = arith.constant 0 : i32
    %c0_i32_1 = arith.constant 0 : i32
    return %c0_i32, %c0_i32_0 : i32, i32
  }
  func.func @transform_2(%arg0: i32) -> (i32, i32) {
    %c0_i32 = arith.constant 0 : i32
    %c0_i32_0 = arith.constant 0 : i32
    %c0_i32_1 = arith.constant 0 : i32
    return %c0_i32, %c0_i32_0 : i32, i32
  }
  func.func @transform_3(%arg0: i32) -> (i32, i32) {
    %c0_i32 = arith.constant 0 : i32
    %c0_i32_0 = arith.constant 0 : i32
    %c0_i32_1 = arith.constant 0 : i32
    return %c0_i32, %c0_i32_0 : i32, i32
  }
  func.func @transform_4(%arg0: i32) -> (i32, i32) {
    %c0_i32 = arith.constant 0 : i32
    %c0_i32_0 = arith.constant 0 : i32
    %c0_i32_1 = arith.constant 0 : i32
    return %c0_i32, %c0_i32_0 : i32, i32
  }
  func.func @transform_5(%arg0: i32) -> (i32, i32) {
    %c0_i32 = arith.constant 0 : i32
    %c0_i32_0 = arith.constant 0 : i32
    %c0_i32_1 = arith.constant 0 : i32
    return %c0_i32, %c0_i32_0 : i32, i32
  }
  func.func @transform_6(%arg0: i32) -> (i32, i32) {
    %c0_i32 = arith.constant 0 : i32
    %c0_i32_0 = arith.constant 0 : i32
    %c0_i32_1 = arith.constant 0 : i32
    return %c0_i32, %c0_i32_0 : i32, i32
  }
  func.func @transform_7(%arg0: i32) -> (i32, i32, i32) {
    %c0_i32 = arith.constant 0 : i32
    %c0_i32_0 = arith.constant 0 : i32
    %c0_i32_1 = arith.constant 0 : i32
    return %arg0, %c0_i32, %c0_i32_0 : i32, i32, i32
  }
}

</mosaic_0001>

<bundles_post_ra>
// kernel: tpu_custom_call.1
= control target key start
LH: loop header
LB: loop body
LE: loop exit
PB: predicated region body
PF: predicated region fallthrough
CT: control target
= control target key end

     0   :  { %s1369_s0 = inlined_call_operand.vmem [shape: f32[256,64], index: 0, kind: input, shape index: {}]   ;;  %s1370_s1 = inlined_call_operand.vmem [shape: f32[128,64], index: 1, kind: input, shape index: {}]   ;;  %s1371_s2 = inlined_call_operand.vmem [shape: f32[128,1], index: 2, kind: input, shape index: {}]   ;;  %s1372_s3 = inlined_call_operand.vmem [shape: f32[32,128], index: 3, kind: input, shape index: {}]   ;;  %s1373_s4 = inlined_call_operand.vmem [shape: f32[32,1], index: 4, kind: input, shape index: {}]   ;;  %s1374_s5 = inlined_call_operand.vmem [shape: f32[1,32], index: 5, kind: input, shape index: {}]   ;;  %s1375_s6 = inlined_call_operand.<no memory space> [shape: f32[1,1], index: 6, kind: input, shape index: {}]   ;;  %s1376_s7 = inlined_call_operand.hbm [shape: f32[1,1,256], index: 7, kind: output, shape index: {}]  }
   0x1   :  { %v12_v0 = vstv %s1375_s6 }
   0x2   :  { %13 = vst [vmem:[#allocation2] sm:$0x1] %v12_v0 }
   0x3   :  { %v45_v1 = vld [vmem:[%s1369_s0 + $0x80] sm:$0xff]  ;;  %v46_v2 = vld [vmem:[%s1369_s0 + $0x88] sm:$0xff]  ;;  %vm173_vm0 = vcmask 523264   ;;  %v47_v7 = vld [vmem:[%s1369_s0 + $0x90] sm:$0xff]  ;;  %v1012_v8 = vmov 0  }
   0x4   :  { %v29_v3 = vld [vmem:[%s1369_s0] sm:$0xff]  ;;  %v886_v4 = vpack.c.bf16 %v46_v2, %v45_v1  ;;  %vm1070_vm1 = vmpackc.low %vm173_vm0, %vm173_vm0  ;;  %v30_v6 = vld [vmem:[%s1369_s0 + $0x8] sm:$0xff]  ;;  %978 = vset.pattern.permute.xlu0 %v1012_v8  ;;  %979 = vset.pattern.permute.xlu1 %v1012_v8 }
   0x5   :  { %v889_v9 = vpack.c.bf16 %v30_v6, %v29_v3  ;;  %v48_v10 = vld [vmem:[%s1369_s0 + $0x98] sm:$0xff]  ;;  %v31_v12 = vld [vmem:[%s1369_s0 + $0x10] sm:$0xff]  ;;  %v49_v14 = vld [vmem:[%s1369_s0 + $0xa0] sm:$0xff] }
   0x6   :  { %888 = vmatprep.subr.msk.bf16.mxu0 %vm1070_vm1, %v886_v4  ;;  %v892_v11 = vpack.c.bf16 %v48_v10, %v47_v7  ;;  %v32_v13 = vld [vmem:[%s1369_s0 + $0x18] sm:$0xff]  ;;  %v50_v15 = vld [vmem:[%s1369_s0 + $0xa8] sm:$0xff]  ;;  %v1104_v18 = vld [vmem:[%s1370_s1] sm:$0xff] }
   0x7   :  { %891 = vmatpush3.bf16.xpose.msk.msra.mxu0 %vm1070_vm1, %v889_v9  ;;  %v895_v16 = vpack.c.bf16 %v32_v13, %v31_v12  ;;  %v898_v17 = vpack.c.bf16 %v50_v15, %v49_v14  ;;  %854 = vmatprep.mubr.msk.f32.mxu0 %vm173_vm0, %v1104_v18  ;;  %v33_v19 = vld [vmem:[%s1369_s0 + $0x20] sm:$0xff]  ;;  %v34_v20 = vld [vmem:[%s1369_s0 + $0x28] sm:$0xff]  ;;  %v51_v21 = vld [vmem:[%s1369_s0 + $0xb0] sm:$0xff] }
   0x8   :  { %894 = vmatprep.subr.msk.bf16.mxu0 %vm1070_vm1, %v892_v11  ;;  %v52_v22 = vld [vmem:[%s1369_s0 + $0xb8] sm:$0xff]  ;;  %v901_v23 = vpack.c.bf16 %v34_v20, %v33_v19  ;;  %v77_v24 = vld [vmem:[%s1371_s2] sm:$0xff]  ;;  %v79_v26 = vld [vmem:[%s1371_s2 + $0x10] sm:$0xff] }
   0x9   :  { %v904_v25 = vpack.c.bf16 %v52_v22, %v51_v21  ;;  %95 = vperm.xlu0 %978, %v77_v24   ;;  %v78_v27 = vld [vmem:[%s1371_s2 + $0x8] sm:$0xff]  ;;  %105 = vperm.xlu1 %979, %v79_v26   ;;  %v80_v28 = vld [vmem:[%s1371_s2 + $0x18] sm:$0xff]  ;;  %v35_v29 = vld [vmem:[%s1369_s0 + $0x30] sm:$0xff] }
   0xa   :  { %v36_v30 = vld [vmem:[%s1369_s0 + $0x38] sm:$0xff]  ;;  %v53_v31 = vld [vmem:[%s1369_s0 + $0xc0] sm:$0xff]  ;;  %v54_v32 = vld [vmem:[%s1369_s0 + $0xc8] sm:$0xff] }
   0xb   :  { %v81_v33 = vld [vmem:[%s1371_s2 + $0x20] sm:$0xff]  ;;  %v82_v34 = vld [vmem:[%s1371_s2 + $0x28] sm:$0xff] }
   0xd   :  { %100 = vperm.xlu0 %978, %v78_v27   ;;  %110 = vperm.xlu1 %979, %v80_v28  }
   0xf   :  { %897 = vmatpush3.bf16.xpose.msk.msra.mxu0 %vm1070_vm1, %v895_v16 }
  0x10   :  { %900 = vmatprep.subr.msk.bf16.mxu0 %vm1070_vm1, %v898_v17 }
  0x17   :  { %903 = vmatpush3.bf16.xpose.msk.msra.mxu0 %vm1070_vm1, %v901_v23 }
  0x18   :  { %906 = vmatprep.subr.msk.bf16.mxu0 %vm1070_vm1, %v904_v25 }
  0x19   :  { %14 = vsyncpa [#allocation4], 0  ;;  %v907_v35 = vpack.c.bf16 %v36_v30, %v35_v29  ;;  %v910_v36 = vpack.c.bf16 %v54_v32, %v53_v31  ;;  %115 = vperm.xlu0 %978, %v81_v33   ;;  %v83_v37 = vld [vmem:[%s1371_s2 + $0x30] sm:$0xff]  ;;  %120 = vperm.xlu1 %979, %v82_v34   ;;  %v84_v38 = vld [vmem:[%s1371_s2 + $0x38] sm:$0xff]  ;;  %v1013_v24 = vmov 0.0   ;;  %vm647_vm2 = vcmask 261120  }
  0x1a   :  { %v37_v39 = vld [vmem:[%s1369_s0 + $0x40] sm:$0xff]  ;;  %v38_v40 = vld [vmem:[%s1369_s0 + $0x48] sm:$0xff]  ;;  %v55_v41 = vld [vmem:[%s1369_s0 + $0xd0] sm:$0xff]  ;;  %603 = vmatprep.mubr.f32.mxu1 %v1013_v24 }
  0x1b   :  { %v56_v42 = vld [vmem:[%s1369_s0 + $0xd8] sm:$0xff]  ;;  %v85_v43 = vld [vmem:[%s1371_s2 + $0x40] sm:$0xff]  ;;  %v86_v44 = vld [vmem:[%s1371_s2 + $0x48] sm:$0xff]  ;;  %v913_v45 = vpack.c.bf16 %v38_v40, %v37_v39 }
  0x1c   :  { %v916_v46 = vpack.c.bf16 %v56_v42, %v55_v41  ;;  %v87_v47 = vld [vmem:[%s1371_s2 + $0x50] sm:$0xff]  ;;  %v88_v48 = vld [vmem:[%s1371_s2 + $0x58] sm:$0xff]  ;;  %v57_v51 = vld [vmem:[%s1369_s0 + $0xe0] sm:$0xff] }
  0x1d   :  { %125 = vperm.xlu0 %978, %v83_v37   ;;  %130 = vperm.xlu1 %979, %v84_v38   ;;  %v39_v49 = vld [vmem:[%s1369_s0 + $0x50] sm:$0xff]  ;;  %v40_v50 = vld [vmem:[%s1369_s0 + $0x58] sm:$0xff]  ;;  %v58_v52 = vld [vmem:[%s1369_s0 + $0xe8] sm:$0xff] }
  0x1e   :  { %v89_v53 = vld [vmem:[%s1371_s2 + $0x60] sm:$0xff]  ;;  %v90_v54 = vld [vmem:[%s1371_s2 + $0x68] sm:$0xff]  ;;  %v919_v55 = vpack.c.bf16 %v40_v50, %v39_v49  ;;  %v922_v56 = vpack.c.bf16 %v58_v52, %v57_v51  ;;  %v91_v57 = vld [vmem:[%s1371_s2 + $0x70] sm:$0xff] }
  0x1f   :  { %909 = vmatpush3.bf16.xpose.msk.msra.mxu0 %vm1070_vm1, %v907_v35  ;;  %v92_v58 = vld [vmem:[%s1371_s2 + $0x78] sm:$0xff]  ;;  %v41_v59 = vld [vmem:[%s1369_s0 + $0x60] sm:$0xff]  ;;  %v42_v60 = vld [vmem:[%s1369_s0 + $0x68] sm:$0xff] }
  0x20   :  { %912 = vmatprep.subr.msk.bf16.mxu0 %vm1070_vm1, %v910_v36  ;;  %v59_v61 = vld [vmem:[%s1369_s0 + $0xf0] sm:$0xff]  ;;  %v60_v62 = vld [vmem:[%s1369_s0 + $0xf8] sm:$0xff]  ;;  %v515_v63 = vld [vmem:[%s1373_s4] sm:$0xff]  ;;  %v925_v1 = vpack.c.bf16 %v42_v60, %v41_v59 }
  0x21   :  { %135 = vperm.xlu0 %978, %v85_v43   ;;  %140 = vperm.xlu1 %979, %v86_v44   ;;  %v516_v0 = vld [vmem:[%s1373_s4 + $0x8] sm:$0xff]  ;;  %v928_v2 = vpack.c.bf16 %v60_v62, %v59_v61  ;;  %v517_v3 = vld [vmem:[%s1373_s4 + $0x10] sm:$0xff]  ;;  %v518_v4 = vld [vmem:[%s1373_s4 + $0x18] sm:$0xff] }
  0x22   :  { %v43_v6 = vld [vmem:[%s1369_s0 + $0x70] sm:$0xff]  ;;  %v44_v7 = vld [vmem:[%s1369_s0 + $0x78] sm:$0xff]  ;;  %v637_v8 = vld [vmem:[#allocation2] sm:$0x1] }
  0x23   :  { %v931_v9 = vpack.c.bf16 %v44_v7, %v43_v6  ;;  %v62_v10 = vld [vmem:[%s1370_s1 + $0x8] sm:$0xff]  ;;  %v63_v11 = vld [vmem:[%s1370_s1 + $0x10] sm:$0xff]  ;;  %v64_v5 = vld [vmem:[%s1370_s1 + $0x18] sm:$0xff] }
  0x24   :  { %v65_v12 = vld [vmem:[%s1370_s1 + $0x20] sm:$0xff]  ;;  %v66_v13 = vld [vmem:[%s1370_s1 + $0x28] sm:$0xff]  ;;  %v67_v14 = vld [vmem:[%s1370_s1 + $0x30] sm:$0xff] }
  0x25   :  { %145 = vperm.xlu0 %978, %v87_v47   ;;  %150 = vperm.xlu1 %979, %v88_v48   ;;  %v68_v15 = vld [vmem:[%s1370_s1 + $0x38] sm:$0xff]  ;;  %v69_v16 = vld [vmem:[%s1370_s1 + $0x40] sm:$0xff]  ;;  %v70_v17 = vld [vmem:[%s1370_s1 + $0x48] sm:$0xff] }
  0x26   :  { %v72_v19 = vld [vmem:[%s1370_s1 + $0x58] sm:$0xff]  ;;  %v73_v20 = vld [vmem:[%s1370_s1 + $0x60] sm:$0xff]  ;;  %v74_v21 = vld [vmem:[%s1370_s1 + $0x68] sm:$0xff] }
  0x27   :  { %915 = vmatpush3.bf16.xpose.msk.msra.mxu0 %vm1070_vm1, %v913_v45  ;;  %v75_v22 = vld [vmem:[%s1370_s1 + $0x70] sm:$0xff]  ;;  %v76_v23 = vld [vmem:[%s1370_s1 + $0x78] sm:$0xff] }
  0x28   :  { %918 = vmatprep.subr.msk.bf16.mxu0 %vm1070_vm1, %v916_v46 }
  0x29   :  { %155 = vperm.xlu0 %978, %v89_v53   ;;  %160 = vperm.xlu1 %979, %v90_v54  }
  0x2d   :  { %165 = vperm.xlu0 %978, %v91_v57   ;;  %170 = vperm.xlu1 %979, %v92_v58  }
  0x2f   :  { %921 = vmatpush3.bf16.xpose.msk.msra.mxu0 %vm1070_vm1, %v919_v55 }
  0x30   :  { %924 = vmatprep.subr.msk.bf16.mxu0 %vm1070_vm1, %v922_v56 }
  0x31   :  { %521 = vperm.xlu0 %978, %v515_v63   ;;  %526 = vperm.xlu1 %979, %v516_v0  }
  0x35   :  { %531 = vperm.xlu0 %978, %v517_v3   ;;  %536 = vperm.xlu1 %979, %v518_v4  }
  0x37   :  { %927 = vmatpush3.bf16.xpose.msk.msra.mxu0 %vm1070_vm1, %v925_v1 }
  0x38   :  { %930 = vmatprep.subr.msk.bf16.mxu0 %vm1070_vm1, %v928_v2 }
  0x39   :  { %640 = vperm.xlu0 %978, %v637_v8  }
  0x3f   :  { %933 = vmatpush3.bf16.xpose.msk.msra.mxu0 %vm1070_vm1, %v931_v9 }
  0x46   :  { %855 = vmatmul.mubr.msk.f32.vlgmr.msra.gmra.mrb[0].mxu0 %vm173_vm0, %v1104_v18  ;;  %v71_v18 = vld [vmem:[%s1370_s1 + $0x50] sm:$0xff] }
  0x47   :  { %856 = vmatprep.mubr.msk.f32.mxu0 %vm173_vm0, %v62_v10 }
  0x4a   :  { %857 = vmatmul.mubr.msk.f32.gmra.mrb[2].mxu0 %vm173_vm0, %v62_v10 }
  0x4b   :  { %858 = vmatprep.mubr.msk.f32.mxu0 %vm173_vm0, %v63_v11 }
  0x4e   :  { %859 = vmatmul.mubr.msk.f32.gmra.mrb[4].mxu0 %vm173_vm0, %v63_v11 }
  0x4f   :  { %860 = vmatprep.mubr.msk.f32.mxu0 %vm173_vm0, %v64_v5 }
  0x52   :  { %861 = vmatmul.mubr.msk.f32.gmra.mrb[6].mxu0 %vm173_vm0, %v64_v5 }
  0x53   :  { %862 = vmatprep.mubr.msk.f32.mxu0 %vm173_vm0, %v65_v12 }
  0x56   :  { %863 = vmatmul.mubr.msk.f32.gmra.mrb[8].mxu0 %vm173_vm0, %v65_v12 }
  0x57   :  { %864 = vmatprep.mubr.msk.f32.mxu0 %vm173_vm0, %v66_v13 }
  0x5a   :  { %865 = vmatmul.mubr.msk.f32.gmra.mrb[10].mxu0 %vm173_vm0, %v66_v13 }
  0x5b   :  { %866 = vmatprep.mubr.msk.f32.mxu0 %vm173_vm0, %v67_v14 }
  0x5e   :  { %867 = vmatmul.mubr.msk.f32.gmra.mrb[12].mxu0 %vm173_vm0, %v67_v14 }
  0x5f   :  { %868 = vmatprep.mubr.msk.f32.mxu0 %vm173_vm0, %v68_v15 }
  0x62   :  { %869 = vmatmul.mubr.msk.f32.gmra.mrb[14].mxu0 %vm173_vm0, %v68_v15 }
  0x63   :  { %870 = vmatprep.mubr.msk.f32.mxu0 %vm173_vm0, %v69_v16 }
  0x66   :  { %871 = vmatmul.mubr.msk.f32.gmra.mrb[16].mxu0 %vm173_vm0, %v69_v16 }
  0x67   :  { %872 = vmatprep.mubr.msk.f32.mxu0 %vm173_vm0, %v70_v17 }
  0x6a   :  { %873 = vmatmul.mubr.msk.f32.gmra.mrb[18].mxu0 %vm173_vm0, %v70_v17 }
  0x6b   :  { %874 = vmatprep.mubr.msk.f32.mxu0 %vm173_vm0, %v71_v18 }
  0x6e   :  { %875 = vmatmul.mubr.msk.f32.gmra.mrb[20].mxu0 %vm173_vm0, %v71_v18 }
  0x6f   :  { %876 = vmatprep.mubr.msk.f32.mxu0 %vm173_vm0, %v72_v19 }
  0x72   :  { %877 = vmatmul.mubr.msk.f32.gmra.mrb[22].mxu0 %vm173_vm0, %v72_v19 }
  0x73   :  { %878 = vmatprep.mubr.msk.f32.mxu0 %vm173_vm0, %v73_v20 }
  0x76   :  { %879 = vmatmul.mubr.msk.f32.gmra.mrb[24].mxu0 %vm173_vm0, %v73_v20 }
  0x77   :  { %880 = vmatprep.mubr.msk.f32.mxu0 %vm173_vm0, %v74_v21 }
  0x7a   :  { %881 = vmatmul.mubr.msk.f32.gmra.mrb[26].mxu0 %vm173_vm0, %v74_v21 }
  0x7b   :  { %882 = vmatprep.mubr.msk.f32.mxu0 %vm173_vm0, %v75_v22 }
  0x7e   :  { %883 = vmatmul.mubr.msk.f32.gmra.mrb[28].mxu0 %vm173_vm0, %v75_v22 }
  0x7f   :  { %884 = vmatprep.mubr.msk.f32.mxu0 %vm173_vm0, %v76_v23 }
  0x82   :  { %885 = vmatmul.mubr.msk.f32.gmra.mrb[30].mxu0 %vm173_vm0, %v76_v23 }
  0x88   :  { %v96_v25 = vpop.permute.xlu0 %95  ;;  %v106_v34 = vpop.permute.xlu1 %105 }
  0x8c   :  { %v101_v29 = vpop.permute.xlu0 %100  ;;  %v111_v45 = vpop.permute.xlu1 %110 }
  0x98   :  { %v116_v58 = vpop.permute.xlu0 %115  ;;  %v121_v61 = vpop.permute.xlu1 %120 }
  0x9c   :  { %v126_v11 = vpop.permute.xlu0 %125  ;;  %v131_v13 = vpop.permute.xlu1 %130 }
 0x119   :  { %v384_v26 = vpop.f32.mrb[0].mxu0 }
 0x11a   :  { %v386_v27 = vpop.f32.mrb[1].mxu0  ;;  %v385_v28 = vadd.f32 %v384_v26, %v96_v25 }
 0x11b   :  { %v387_v30 = vadd.f32 %v386_v27, %v96_v25  ;;  %v136_v27 = vpop.permute.xlu0 %135 }
 0x11c   :  { %v479_v36 = vmax.f32 %v385_v28, 0.0 }
 0x11d   :  { %v390_v31 = vpop.f32.mrb[2].mxu0  ;;  %v480_v38 = vmax.f32 %v387_v30, 0.0  ;;  %v141_v30 = vpop.permute.xlu1 %140 }
 0x11e   :  { %v391_v32 = vadd.f32 %v390_v31, %v101_v29  ;;  %v392_v33 = vpop.f32.mrb[3].mxu0 }
 0x11f   :  { %v393_v35 = vadd.f32 %v392_v33, %v101_v29 }
 0x120   :  { %v481_v37 = vmax.f32 %v391_v32, 0.0 }
 0x121   :  { %v482_v39 = vmax.f32 %v393_v35, 0.0  ;;  %v396_v40 = vpop.f32.mrb[4].mxu0 }
 0x122   :  { %v398_v41 = vpop.f32.mrb[5].mxu0  ;;  %v936_v42 = vpack.c.bf16 %v481_v37, %v479_v36  ;;  %v397_v44 = vadd.f32 %v396_v40, %v106_v34 }
 0x123   :  { %v934_v43 = vpack.c.bf16 %v482_v39, %v480_v38  ;;  %v399_v46 = vadd.f32 %v398_v41, %v106_v34 }
 0x124   :  { %v483_v51 = vmax.f32 %v397_v44, 0.0 }
 0x125   :  { %v402_v47 = vpop.f32.mrb[6].mxu0  ;;  %935 = vmatprep.subr.bf16.mxu1 %v934_v43  ;;  %v484_v53 = vmax.f32 %v399_v46, 0.0  ;;  %v146_v43 = vpop.permute.xlu0 %145 }
 0x126   :  { %v403_v48 = vadd.f32 %v402_v47, %v111_v45  ;;  %v404_v49 = vpop.f32.mrb[7].mxu0  ;;  %937 = vmatpush1.bf16.msra.mxu1 %v936_v42  ;;  %v151_v46 = vpop.permute.xlu1 %150 }
 0x127   :  { %v405_v50 = vadd.f32 %v404_v49, %v111_v45 }
 0x128   :  { %v485_v52 = vmax.f32 %v403_v48, 0.0 }
 0x129   :  { %v486_v54 = vmax.f32 %v405_v50, 0.0  ;;  %v408_v55 = vpop.f32.mrb[8].mxu0 }
 0x12a   :  { %v940_v56 = vpack.c.bf16 %v485_v52, %v483_v51  ;;  %v410_v57 = vpop.f32.mrb[9].mxu0  ;;  %v409_v60 = vadd.f32 %v408_v55, %v116_v58 }
 0x12b   :  { %v938_v59 = vpack.c.bf16 %v486_v54, %v484_v53  ;;  %v411_v62 = vadd.f32 %v410_v57, %v116_v58 }
 0x12c   :  { %v487_v3 = vmax.f32 %v409_v60, 0.0 }
 0x12d   :  { %v414_v63 = vpop.f32.mrb[10].mxu0  ;;  %939 = vmatprep.subr.bf16.mxu1 %v938_v59  ;;  %v488_v6 = vmax.f32 %v411_v62, 0.0  ;;  %v156_v59 = vpop.permute.xlu0 %155 }
 0x12e   :  { %v415_v0 = vadd.f32 %v414_v63, %v121_v61  ;;  %v416_v1 = vpop.f32.mrb[11].mxu0  ;;  %941 = vmatpush1.bf16.msra.mxu1 %v940_v56  ;;  %v161_v62 = vpop.permute.xlu1 %160 }
 0x12f   :  { %v417_v2 = vadd.f32 %v416_v1, %v121_v61 }
 0x130   :  { %v489_v4 = vmax.f32 %v415_v0, 0.0 }
 0x131   :  { %v490_v7 = vmax.f32 %v417_v2, 0.0  ;;  %v420_v8 = vpop.f32.mrb[12].mxu0 }
 0x132   :  { %v944_v9 = vpack.c.bf16 %v489_v4, %v487_v3  ;;  %v422_v10 = vpop.f32.mrb[13].mxu0  ;;  %v421_v12 = vadd.f32 %v420_v8, %v126_v11 }
 0x133   :  { %v942_v5 = vpack.c.bf16 %v490_v7, %v488_v6  ;;  %v423_v14 = vadd.f32 %v422_v10, %v126_v11 }
 0x134   :  { %v491_v19 = vmax.f32 %v421_v12, 0.0 }
 0x135   :  { %v426_v15 = vpop.f32.mrb[14].mxu0  ;;  %943 = vmatprep.subr.bf16.mxu1 %v942_v5  ;;  %v492_v21 = vmax.f32 %v423_v14, 0.0  ;;  %v166_v5 = vpop.permute.xlu0 %165 }
 0x136   :  { %v427_v16 = vadd.f32 %v426_v15, %v131_v13  ;;  %v428_v17 = vpop.f32.mrb[15].mxu0  ;;  %945 = vmatpush1.bf16.msra.mxu1 %v944_v9  ;;  %v171_v14 = vpop.permute.xlu1 %170 }
 0x137   :  { %v429_v18 = vadd.f32 %v428_v17, %v131_v13 }
 0x138   :  { %v493_v20 = vmax.f32 %v427_v16, 0.0 }
 0x139   :  { %v494_v22 = vmax.f32 %v429_v18, 0.0  ;;  %v432_v23 = vpop.f32.mrb[16].mxu0 }
 0x13a   :  { %v948_v25 = vpack.c.bf16 %v493_v20, %v491_v19  ;;  %v434_v26 = vpop.f32.mrb[17].mxu0  ;;  %v433_v29 = vadd.f32 %v432_v23, %v136_v27 }
 0x13b   :  { %v946_v28 = vpack.c.bf16 %v494_v22, %v492_v21  ;;  %v435_v31 = vadd.f32 %v434_v26, %v136_v27  ;;  %v511_v27 = vld [vmem:[%s1372_s3] sm:$0xff] }
 0x13c   :  { %v495_v36 = vmax.f32 %v433_v29, 0.0  ;;  %v513_v29 = vld [vmem:[%s1372_s3 + $0x10] sm:$0xff] }
 0x13d   :  { %v438_v32 = vpop.f32.mrb[18].mxu0  ;;  %947 = vmatprep.subr.bf16.mxu1 %v946_v28  ;;  %v496_v38 = vmax.f32 %v435_v31, 0.0  ;;  %v512_v28 = vld [vmem:[%s1372_s3 + $0x8] sm:$0xff] }
 0x13e   :  { %v439_v33 = vadd.f32 %v438_v32, %v141_v30  ;;  %v440_v34 = vpop.f32.mrb[19].mxu0  ;;  %949 = vmatpush1.bf16.msra.mxu1 %v948_v25 }
 0x13f   :  { %v441_v35 = vadd.f32 %v440_v34, %v141_v30  ;;  %v514_v30 = vld [vmem:[%s1372_s3 + $0x18] sm:$0xff] }
 0x140   :  { %v497_v37 = vmax.f32 %v439_v33, 0.0  ;;  %v522_v33 = vpop.permute.xlu0 %521 }
 0x141   :  { %v498_v39 = vmax.f32 %v441_v35, 0.0  ;;  %v444_v40 = vpop.f32.mrb[20].mxu0  ;;  %v527_v35 = vpop.permute.xlu1 %526 }
 0x142   :  { %v952_v41 = vpack.c.bf16 %v497_v37, %v495_v36  ;;  %v446_v42 = vpop.f32.mrb[21].mxu0  ;;  %v445_v45 = vadd.f32 %v444_v40, %v146_v43 }
 0x143   :  { %v950_v44 = vpack.c.bf16 %v498_v39, %v496_v38  ;;  %v447_v47 = vadd.f32 %v446_v42, %v146_v43 }
 0x144   :  { %v499_v52 = vmax.f32 %v445_v45, 0.0 }
 0x145   :  { %v450_v48 = vpop.f32.mrb[22].mxu0  ;;  %951 = vmatprep.subr.bf16.mxu1 %v950_v44  ;;  %v500_v54 = vmax.f32 %v447_v47, 0.0 }
 0x146   :  { %v451_v49 = vadd.f32 %v450_v48, %v151_v46  ;;  %v452_v50 = vpop.f32.mrb[23].mxu0  ;;  %953 = vmatpush1.bf16.msra.mxu1 %v952_v41  ;;  %v532_v48 = vpop.permute.xlu0 %531 }
 0x147   :  { %v453_v51 = vadd.f32 %v452_v50, %v151_v46  ;;  %v537_v50 = vpop.permute.xlu1 %536 }
 0x148   :  { %v501_v53 = vmax.f32 %v451_v49, 0.0 }
 0x149   :  { %v502_v55 = vmax.f32 %v453_v51, 0.0  ;;  %v456_v56 = vpop.f32.mrb[24].mxu0 }
 0x14a   :  { %v956_v57 = vpack.c.bf16 %v501_v53, %v499_v52  ;;  %v458_v58 = vpop.f32.mrb[25].mxu0  ;;  %v457_v61 = vadd.f32 %v456_v56, %v156_v59 }
 0x14b   :  { %v954_v60 = vpack.c.bf16 %v502_v55, %v500_v54  ;;  %v459_v63 = vadd.f32 %v458_v58, %v156_v59 }
 0x14c   :  { %v503_v4 = vmax.f32 %v457_v61, 0.0 }
 0x14d   :  { %v462_v0 = vpop.f32.mrb[26].mxu0  ;;  %955 = vmatprep.subr.bf16.mxu1 %v954_v60  ;;  %v504_v7 = vmax.f32 %v459_v63, 0.0  ;;  %v643_v63 = vlaneseq }
 0x14e   :  { %v463_v1 = vadd.f32 %v462_v0, %v161_v62  ;;  %v464_v2 = vpop.f32.mrb[27].mxu0  ;;  %957 = vmatpush1.bf16.msra.mxu1 %v956_v57 }
 0x14f   :  { %v465_v3 = vadd.f32 %v464_v2, %v161_v62  ;;  %v636_v62 = vld [vmem:[%s1374_s5] sm:$0x1]  ;;  %v644_v0 = vshrl.u32 %v643_v63, 7  ;;  %v641_v2 = vpop.permute.xlu0 %640  ;;  %s1015_s5 = smov [#allocation3]   ;;  %vm754_vm3 = vcmp.lt.s32.totalorder %v643_v63, 256 }
 0x150   :  { %v505_v6 = vmax.f32 %v463_v1, 0.0  ;;  %s763_s20 = sshll.u32 %s1015_s5, 4  ;;  %s764_s20 = int_to_ptr.vmem [resolvable:$true] %s763_s20 }
 0x151   :  { %v506_v8 = vmax.f32 %v465_v3, 0.0  ;;  %v468_v9 = vpop.f32.mrb[28].mxu0  ;;  %v645_v1 = vsub.s32 0, %v644_v0  ;;  %s988_s21 = scalar_lea.vmem %s764_s20, 32  ;;  %p993_p1 = scmp.lt.s32.totalorder %s764_s20, %s764_s20 }
 0x152   :  { %v960_v10 = vpack.c.bf16 %v505_v6, %v503_v4  ;;  %v470_v11 = vpop.f32.mrb[29].mxu0  ;;  %v469_v13 = vadd.f32 %v468_v9, %v166_v5  ;;  %p989_p0 = scmp.ne.s32.totalorder %s764_s20, %s988_s21  ;;  %p994_p2 = scmp.lt.s32.totalorder %s988_s21, %s988_s21 }
 0x153   :  { %v958_v12 = vpack.c.bf16 %v506_v8, %v504_v7  ;;  %v471_v15 = vadd.f32 %v470_v11, %v166_v5  ;;  %v646_v3 = vrot.slane %v641_v2, %v645_v1 }
 0x154   :  { %v507_v20 = vmax.f32 %v469_v13, 0.0  ;;  %p995_p3 = por %p994_p2, %p993_p1 }
 0x155   :  { %v474_v16 = vpop.f32.mrb[30].mxu0  ;;  %959 = vmatprep.subr.bf16.mxu1 %v958_v12  ;;  %v508_v22 = vmax.f32 %v471_v15, 0.0 }
 0x156   :  { %v475_v17 = vadd.f32 %v474_v16, %v171_v14  ;;  %v476_v18 = vpop.f32.mrb[31].mxu0  ;;  %961 = vmatpush1.bf16.msra.mxu1 %v960_v10  ;;  %p996_p4 = pnand %p995_p3, %p989_p0 }
 0x157   :  { %v477_v19 = vadd.f32 %v476_v18, %v171_v14  ;;  %v1014_v14 = vmov 1966171168  }
 0x158   :  { %v509_v21 = vmax.f32 %v475_v17, 0.0  ;;  %v738_v15 = vunpack.c.l.s4 %v1014_v14 }
 0x159   :  { %v510_v23 = vmax.f32 %v477_v19, 0.0 }
 0x15a   :  { %v964_v25 = vpack.c.bf16 %v509_v21, %v507_v20  ;;  %v739_v16 = vunpack.c.0.s8 %v738_v15 }
 0x15b   :  { %v962_v26 = vpack.c.bf16 %v510_v23, %v508_v22 }
 0x15c   :  { %v742_v18 = vsub.s32 %v739_v16, %v644_v0 }
 0x15d   :  { %963 = vmatprep.subr.bf16.mxu1 %v962_v26 }
 0x15e   :  { %965 = vmatpush1.bf16.msra.mxu1 %v964_v25 }
 0x161   :  { %604 = vmatmul.mubr.f32.vlgmr.msra.gmra.mrb[0].mxu1 %v511_v27 }
 0x162   :  { %609 = vmatprep.mubr.f32.mxu1 %v1013_v24 }
 0x165   :  { %610 = vmatmul.mubr.f32.gmra.mrb[2].mxu1 %v512_v28 }
 0x166   :  { %615 = vmatprep.mubr.f32.mxu1 %v1013_v24 }
 0x169   :  { %616 = vmatmul.mubr.f32.gmra.mrb[4].mxu1 %v513_v29 }
 0x16a   :  { %621 = vmatprep.mubr.f32.mxu1 %v1013_v24 }
 0x16d   :  { %622 = vmatmul.mubr.f32.gmra.mrb[6].mxu1 %v514_v30 }
 0x16e   :  { %715 = vmatprep.mubr.f32.mxu1 %v1013_v24 }
 0x234   :  { %v605_v31 = vpop.f32.mrb[0].mxu1 }
 0x235   :  { %v607_v32 = vpop.f32.mrb[1].mxu1  ;;  %v606_v34 = vadd.f32 %v605_v31, %v522_v33 }
 0x236   :  { %v608_v36 = vadd.f32 %v607_v32, %v522_v33 }
 0x237   :  { %v628_v41 = vmax.f32 %v606_v34, 0.0 }
 0x238   :  { %v611_v37 = vpop.f32.mrb[2].mxu1  ;;  %v629_v43 = vmax.f32 %v608_v36, 0.0 }
 0x239   :  { %v612_v38 = vadd.f32 %v611_v37, %v527_v35  ;;  %v613_v39 = vpop.f32.mrb[3].mxu1 }
 0x23a   :  { %v614_v40 = vadd.f32 %v613_v39, %v527_v35 }
 0x23b   :  { %v630_v42 = vmax.f32 %v612_v38, 0.0 }
 0x23c   :  { %v631_v44 = vmax.f32 %v614_v40, 0.0  ;;  %v617_v45 = vpop.f32.mrb[4].mxu1 }
 0x23d   :  { %v968_v46 = vpack.c.bf16 %v630_v42, %v628_v41  ;;  %v619_v47 = vpop.f32.mrb[5].mxu1  ;;  %v618_v24 = vadd.f32 %v617_v45, %v532_v48 }
 0x23e   :  { %v966_v49 = vpack.c.bf16 %v631_v44, %v629_v43  ;;  %v620_v51 = vadd.f32 %v619_v47, %v532_v48 }
 0x23f   :  { %v632_v56 = vmax.f32 %v618_v24, 0.0 }
 0x240   :  { %v623_v52 = vpop.f32.mrb[6].mxu1  ;;  %967 = vmatprep.subr.bf16.mxu1 %v966_v49  ;;  %v633_v58 = vmax.f32 %v620_v51, 0.0 }
 0x241   :  { %v624_v53 = vadd.f32 %v623_v52, %v537_v50  ;;  %v625_v54 = vpop.f32.mrb[7].mxu1  ;;  %969 = vmatpush1.bf16.msra.mxu1 %v968_v46 }
 0x242   :  { %v626_v55 = vadd.f32 %v625_v54, %v537_v50 }
 0x243   :  { %v634_v57 = vmax.f32 %v624_v53, 0.0 }
 0x244   :  { %v635_v59 = vmax.f32 %v626_v55, 0.0 }
 0x245   :  { %v972_v60 = vpack.c.bf16 %v634_v57, %v632_v56 }
 0x246   :  { %v970_v61 = vpack.c.bf16 %v635_v59, %v633_v58 }
 0x248   :  { %971 = vmatprep.subr.bf16.mxu1 %v970_v61 }
 0x249   :  { %973 = vmatpush1.bf16.msra.mxu1 %v972_v60 }
 0x24c   :  { %819 = vmatmul.mubr.msk.f32.vlgmr.msra.gmra.mrb[8].mxu1 %vm647_vm2, %v636_v62 }
 0x31f   :  { %v717_v4 = vpop.f32.mrb[8].mxu1 }
 0x320   :  { %v718_v6 = vadd.f32 %v717_v4, %v646_v3  ;;  %v719_v7 = vpop.f32.mrb[9].mxu1 }
 0x321   :  { %v720_v8 = vadd.f32 %v719_v7, %v646_v3 }
 0x322   :  { %v820_v9 = vmul.f32 -1.442695, %v718_v6 }
 0x323   :  { %v821_v10 = vmul.f32 -1.442695, %v720_v8 }
 0x324   :  { %980 = vpow2.f32 %v820_v9 }
 0x325   :  { %982 = vpow2.f32 %v821_v10 }
 0x32e   :  { %v981_v11 = vpop.eup %980 }
 0x32f   :  { %v983_v5 = vpop.eup %982  ;;  %v728_v12 = vadd.f32 1.0, %v981_v11 }
 0x330   :  { %v729_v13 = vadd.f32 1.0, %v983_v5 }
 0x331   :  { %984 = vrcp.f32 %v728_v12 }
 0x332   :  { %986 = vrcp.f32 %v729_v13 }
 0x33b   :  { %v985_v17 = vpop.eup %984 }
 0x33c   :  { %v987_v19 = vpop.eup %986 }
 0x33d   :  { %v736_v20 = vcombine.low %v985_v17, %v987_v19 }
 0x33f   :  { %v743_v21 = vrot.slane %v736_v20, %v742_v18 }
 0x341   :  { %v750_v22 = vrot.slane %v743_v21, %v742_v18 }
 0x343   :  { %756 = vst.msk [vmem:[#allocation3] sm:$0x3] %vm754_vm3, %v750_v22 }
 0x344   :  { %999 = shalt.err (!%p996_p4)
}
 0x345   :  { %s1000_s23 = scalar_lea.hbm %s1376_s7, 32 }
 0x346   :  { %p1001_p5 = scmp.ne.s32.totalorder %s1376_s7, %s1000_s23  ;;  %p1004_p6 = scmp.lt.u32.totalorder %s1000_s23, %s1376_s7 }
 0x348   :  { %p1006_p7 = pnand %p1004_p6, %p1001_p5 }
 0x34a   :  { %1009 = shalt.err (!%p1006_p7)
}
 0x34b   :  { %766 = dma.vmem_to_hbm [thread:$0]  %s764_s20, 32, %s1376_s7, [#allocation4]  }
 0x34c   :  { %1010 = dma.done.wait [#allocation4], 32  }
 0x34d   :  { %1011 = vsyncadd [#allocation4], 4294967264 }
 0x34e   :  { %770 = vsyncpa [#allocation4], 1 }

</bundles_post_ra>
